<compile_context>
chip_gen: v7x
topology: tpu7x:2x2x1
jax: 0.10.0
libtpu: 0.0.40
codegen_flags: <defaults>
</compile_context>

<pallas_src>
import jax
import jax.numpy as jnp
from jax.experimental import pallas as pl
from jax.experimental.pallas import tpu as pltpu


def aggregate_kernel(va_ref, vb_ref,
                     w1a_ref, w1b_ref, b1_ref,
                     w2_ref, b2_ref,
                     w3_ref, b3_ref,
                     out_ref,
                     va_acc, vb_acc):
    k = pl.program_id(1)

    @pl.when(k == 0)
    def _init():
        va_acc[...] = jnp.zeros_like(va_acc)
        vb_acc[...] = jnp.zeros_like(vb_acc)

    # Partial sum over this sequence tile: (TM, TS, He) -> (TM, He).
    va_acc[...] += jnp.sum(va_ref[...].astype(jnp.float32), axis=1)
    vb_acc[...] += jnp.sum(vb_ref[...].astype(jnp.float32), axis=1)

    @pl.when(k == pl.num_programs(1) - 1)
    def _finalize():
        va = va_acc[...]
        vb = vb_acc[...]
        # concat([va, vb]) @ w1  ==  va @ w1[:H] + vb @ w1[H:]   (no concat copy)
        h1 = (jnp.dot(va, w1a_ref[...], preferred_element_type=jnp.float32)
              + jnp.dot(vb, w1b_ref[...], preferred_element_type=jnp.float32)
              + b1_ref[...])
        h1 = jnp.maximum(h1, 0.0)
        h2 = jnp.dot(h1, w2_ref[...], preferred_element_type=jnp.float32) + b2_ref[...]
        h2 = jnp.maximum(h2, 0.0)
        y = jnp.dot(h2, w3_ref[...], preferred_element_type=jnp.float32) + b3_ref[...]
        out_ref[...] = y.astype(out_ref.dtype)


def _pick_tile(total, candidates):
    for c in candidates:
        if c <= total and total % c == 0:
            return c
    return total


def aggregate_forward(V_A, V_B, params):
    """Aggregate head forward (dropout == identity / eval semantics).

    V_A, V_B: (B, S, H); params: w1 (2H, NH), b1 (1, NH), w2 (NH, NH),
    b2 (1, NH), w3 (NH, NO), b3 (1, NO); weights are (in, out)-ordered.
    """
    B, S, H = V_A.shape
    assert V_B.shape == (B, S, H)
    NH = params["w2"].shape[0]
    NO = params["w3"].shape[1]

    # --- lane-dense layout for the streaming seq-sum ------------------------
    # With H < 128 each vreg load uses only H/128 lanes. Fold F consecutive
    # sequence positions into the lane axis (free metadata reshape of a
    # contiguous array); the fold is undone algebraically by tiling w1.
    F = 1
    if H < 128 and 128 % H == 0 and S % (128 // H) == 0:
        F = 128 // H
    He = F * H            # feature width the kernel sees
    Se = S // F           # sequence length the kernel sees
    Va = V_A.reshape(B, Se, He)
    Vb = V_B.reshape(B, Se, He)

    # Split w1 (no in-kernel concat) and tile it for the folded layout.
    w1a = jnp.tile(params["w1"][:H, :], (F, 1))      # (He, NH)
    w1b = jnp.tile(params["w1"][H:, :], (F, 1))      # (He, NH)
    b1 = params["b1"].reshape(1, NH)
    w2 = params["w2"]
    b2 = params["b2"].reshape(1, NH)

    # --- lane-dense output: pad num_outputs up to a multiple of 128 ---------
    NOP = ((NO + 127) // 128) * 128
    w3p = jnp.pad(params["w3"], ((0, 0), (0, NOP - NO)))
    b3p = jnp.pad(params["b3"].reshape(1, NO), ((0, 0), (0, NOP - NO)))

    # --- tile selection ------------------------------------------------------
    # Batch tile: multiple of 8 (sublane) or full batch; 256 feeds the
    # 256-wide MXU on v6e/v7x, smaller tiles are fine on v5e.
    TM = _pick_tile(B, (256, 128, 64, 32, 16, 8))
    # Sequence tile: multiple of 8 or the full folded sequence.
    TS = _pick_tile(Se, (256, 128, 64, 32, 16, 8))
    grid = (B // TM, Se // TS)

    # --- explicit VMEM budget (keeps the pipeline inside v7x's scoped limit) -
    db = 4  # f32 bytes
    est = (2 * 2 * TM * TS * He * db                                 # inputs (x2 buf)
           + 2 * (2 * He * NH + NH * NH + NH * NOP + 2 * NH + NOP) * db  # weights
           + 2 * TM * NOP * db                                       # output buffer
           + 2 * TM * He * db                                        # accumulators
           + (4 << 20))                                              # headroom
    vmem_limit = int(min(max(est, 16 << 20), 32 << 20))

    cost = pl.CostEstimate(
        flops=2 * B * S * H + 2 * B * (2 * H * NH + NH * NH + NH * NO),
        transcendentals=0,
        bytes_accessed=(2 * B * S * H
                        + 2 * H * NH + NH * NH + NH * NO
                        + 2 * NH + NO + B * NO) * db,
    )

    out_padded = pl.pallas_call(
        aggregate_kernel,
        out_shape=jax.ShapeDtypeStruct((B, NOP), jnp.float32),
        grid=grid,
        in_specs=[
            pl.BlockSpec((TM, TS, He), lambda i, k: (i, k, 0)),   # V_A tile
            pl.BlockSpec((TM, TS, He), lambda i, k: (i, k, 0)),   # V_B tile
            pl.BlockSpec((He, NH), lambda i, k: (0, 0)),          # w1a (tiled)
            pl.BlockSpec((He, NH), lambda i, k: (0, 0)),          # w1b (tiled)
            pl.BlockSpec((1, NH), lambda i, k: (0, 0)),           # b1
            pl.BlockSpec((NH, NH), lambda i, k: (0, 0)),          # w2
            pl.BlockSpec((1, NH), lambda i, k: (0, 0)),           # b2
            pl.BlockSpec((NH, NOP), lambda i, k: (0, 0)),         # w3 (padded)
            pl.BlockSpec((1, NOP), lambda i, k: (0, 0)),          # b3 (padded)
        ],
        out_specs=pl.BlockSpec((TM, NOP), lambda i, k: (i, 0)),
        scratch_shapes=[
            pltpu.VMEM((TM, He), jnp.float32),   # running sum of V_A
            pltpu.VMEM((TM, He), jnp.float32),   # running sum of V_B
        ],
        compiler_params=pltpu.CompilerParams(
            dimension_semantics=("parallel", "arbitrary"),
            vmem_limit_bytes=vmem_limit,
        ),
        cost_estimate=cost,
    )(Va, Vb, w1a, w1b, b1, w2, b2, w3p, b3p)

    # TODO(synk): optional bf16 streaming of V_A/V_B (keep f32 accumulation)
    # would halve HBM traffic; kept f32 here to preserve tight tolerances.
    return out_padded[:, :NO]


def init_params(key, num_inputs, num_hiddens, num_outputs):
    ks = jax.random.split(key, 6)
    scale = 0.02
    return {
        "w1": scale * jax.random.normal(ks[0], (num_inputs, num_hiddens), jnp.float32),
        "b1": scale * jax.random.normal(ks[1], (1, num_hiddens), jnp.float32),
        "w2": scale * jax.random.normal(ks[2], (num_hiddens, num_hiddens), jnp.float32),
        "b2": scale * jax.random.normal(ks[3], (1, num_hiddens), jnp.float32),
        "w3": scale * jax.random.normal(ks[4], (num_hiddens, num_outputs), jnp.float32),
        "b3": scale * jax.random.normal(ks[5], (1, num_outputs), jnp.float32),
    }


def reference_forward(V_A, V_B, params):
    va = V_A.sum(axis=1)
    vb = V_B.sum(axis=1)
    x = jnp.concatenate([va, vb], axis=1)
    h1 = jnp.maximum(x @ params["w1"] + params["b1"], 0.0)
    h2 = jnp.maximum(h1 @ params["w2"] + params["b2"], 0.0)
    return h2 @ params["w3"] + params["b3"]


if __name__ == "__main__":
    key = jax.random.PRNGKey(0)
    batch, seq, hidden = 2, 8, 32
    num_inputs = 2 * hidden        # cat([V_A.sum, V_B.sum], dim=1)
    num_hiddens = 32
    num_outputs = 3

    k_a, k_b, k_p = jax.random.split(key, 3)
    V_A = jax.random.normal(k_a, (batch, seq, hidden), jnp.float32)
    V_B = jax.random.normal(k_b, (batch, seq, hidden), jnp.float32)
    params = init_params(k_p, num_inputs, num_hiddens, num_outputs)

    out = aggregate_forward(V_A, V_B, params)
    out = jax.block_until_ready(out)

    ref = reference_forward(V_A, V_B, params)
    assert out.shape == (batch, num_outputs)
    assert jnp.allclose(out, ref, atol=1e-4, rtol=1e-4), "mismatch vs reference"

    print("KERNEL_OK")
</pallas_src>

<mosaic_0001>
module attributes {stable_mosaic.version = 11 : i64} {
  func.func @aggregate_kernel(%arg0: i32, %arg1: i32, %arg2: memref<2x2x128xf32, #tpu.memory_space<vmem>>, %arg3: memref<2x2x128xf32, #tpu.memory_space<vmem>>, %arg4: memref<128x32xf32, #tpu.memory_space<vmem>>, %arg5: memref<128x32xf32, #tpu.memory_space<vmem>>, %arg6: memref<1x32xf32, #tpu.memory_space<vmem>>, %arg7: memref<32x32xf32, #tpu.memory_space<vmem>>, %arg8: memref<1x32xf32, #tpu.memory_space<vmem>>, %arg9: memref<32x128xf32, #tpu.memory_space<vmem>>, %arg10: memref<1x128xf32, #tpu.memory_space<vmem>>, %arg11: memref<2x128xf32, #tpu.memory_space<vmem>>, %arg12: memref<2x128xf32, #tpu.memory_space<vmem>>, %arg13: memref<2x128xf32, #tpu.memory_space<vmem>>) attributes {dimension_semantics = [#tpu.dimension_semantics<parallel>, #tpu.dimension_semantics<arbitrary>], iteration_bounds = array<i64: 1, 1>, scalar_prefetch = 0 : i64, scratch_operands = 2 : i64, tpu.core_type = #tpu.core_type<tc>, window_params = [{transform_indices = @transform_0, window_bounds = array<i64: 2, 2, 128>}, {transform_indices = @transform_1, window_bounds = array<i64: 2, 2, 128>}, {pipeline_mode = #tpu.pipeline_mode<synchronous>, transform_indices = @transform_2, window_bounds = array<i64: 128, 32>}, {pipeline_mode = #tpu.pipeline_mode<synchronous>, transform_indices = @transform_3, window_bounds = array<i64: 128, 32>}, {pipeline_mode = #tpu.pipeline_mode<synchronous>, transform_indices = @transform_4, window_bounds = array<i64: 1, 32>}, {pipeline_mode = #tpu.pipeline_mode<synchronous>, transform_indices = @transform_5, window_bounds = array<i64: 32, 32>}, {pipeline_mode = #tpu.pipeline_mode<synchronous>, transform_indices = @transform_6, window_bounds = array<i64: 1, 32>}, {pipeline_mode = #tpu.pipeline_mode<synchronous>, transform_indices = @transform_7, window_bounds = array<i64: 32, 128>}, {pipeline_mode = #tpu.pipeline_mode<synchronous>, transform_indices = @transform_8, window_bounds = array<i64: 1, 128>}, {transform_indices = @transform_9, window_bounds = array<i64: 2, 128>}]} {
    %c0_i32 = arith.constant 0 : i32
    %0 = arith.cmpi eq, %arg1, %c0_i32 : i32
    %1 = arith.extui %0 : i1 to i32
    %c0_i32_0 = arith.constant 0 : i32
    %2 = arith.cmpi ne, %1, %c0_i32_0 : i32
    scf.if %2 {
      %cst_17 = arith.constant 0.000000e+00 : f32
      %16 = vector.broadcast %cst_17 : f32 to vector<2x128xf32>
      %c0_18 = arith.constant 0 : index
      %c0_19 = arith.constant 0 : index
      %17 = vector.load %arg12[%c0_18, %c0_19] : memref<2x128xf32, #tpu.memory_space<vmem>>, vector<2x128xf32>
      tpu.vector_store %arg12[%c0_18, %c0_19], %16 {strides = array<i32>} : memref<2x128xf32, #tpu.memory_space<vmem>>, vector<2x128xf32>,
      %cst_20 = arith.constant 0.000000e+00 : f32
      %18 = vector.broadcast %cst_20 : f32 to vector<2x128xf32>
      %c0_21 = arith.constant 0 : index
      %c0_22 = arith.constant 0 : index
      %19 = vector.load %arg13[%c0_21, %c0_22] : memref<2x128xf32, #tpu.memory_space<vmem>>, vector<2x128xf32>
      tpu.vector_store %arg13[%c0_21, %c0_22], %18 {strides = array<i32>} : memref<2x128xf32, #tpu.memory_space<vmem>>, vector<2x128xf32>,
    } else {
    }
    %c0 = arith.constant 0 : index
    %c0_1 = arith.constant 0 : index
    %3 = vector.load %arg12[%c0, %c0_1] : memref<2x128xf32, #tpu.memory_space<vmem>>, vector<2x128xf32>
    %c0_2 = arith.constant 0 : index
    %c0_3 = arith.constant 0 : index
    %c0_4 = arith.constant 0 : index
    %4 = vector.load %arg2[%c0_2, %c0_3, %c0_4] : memref<2x2x128xf32, #tpu.memory_space<vmem>>, vector<2x2x128xf32>
    %cst = arith.constant dense<0.000000e+00> : vector<2x128xf32>
    %5 = vector.multi_reduction <add>, %4, %cst [1] : vector<2x2x128xf32> to vector<2x128xf32>
    %6 = arith.addf %3, %5 : vector<2x128xf32>
    %c0_5 = arith.constant 0 : index
    %c0_6 = arith.constant 0 : index
    %7 = vector.load %arg12[%c0_5, %c0_6] : memref<2x128xf32, #tpu.memory_space<vmem>>, vector<2x128xf32>
    tpu.vector_store %arg12[%c0_5, %c0_6], %6 {strides = array<i32>} : memref<2x128xf32, #tpu.memory_space<vmem>>, vector<2x128xf32>,
    %c0_7 = arith.constant 0 : index
    %c0_8 = arith.constant 0 : index
    %8 = vector.load %arg13[%c0_7, %c0_8] : memref<2x128xf32, #tpu.memory_space<vmem>>, vector<2x128xf32>
    %c0_9 = arith.constant 0 : index
    %c0_10 = arith.constant 0 : index
    %c0_11 = arith.constant 0 : index
    %9 = vector.load %arg3[%c0_9, %c0_10, %c0_11] : memref<2x2x128xf32, #tpu.memory_space<vmem>>, vector<2x2x128xf32>
    %cst_12 = arith.constant dense<0.000000e+00> : vector<2x128xf32>
    %10 = vector.multi_reduction <add>, %9, %cst_12 [1] : vector<2x2x128xf32> to vector<2x128xf32>
    %11 = arith.addf %8, %10 : vector<2x128xf32>
    %c0_13 = arith.constant 0 : index
    %c0_14 = arith.constant 0 : index
    %12 = vector.load %arg13[%c0_13, %c0_14] : memref<2x128xf32, #tpu.memory_space<vmem>>, vector<2x128xf32>
    tpu.vector_store %arg13[%c0_13, %c0_14], %11 {strides = array<i32>} : memref<2x128xf32, #tpu.memory_space<vmem>>, vector<2x128xf32>,
    %c0_i32_15 = arith.constant 0 : i32
    %13 = arith.cmpi eq, %arg1, %c0_i32_15 : i32
    %14 = arith.extui %13 : i1 to i32
    %c0_i32_16 = arith.constant 0 : i32
    %15 = arith.cmpi ne, %14, %c0_i32_16 : i32
    scf.if %15 {
      %c0_17 = arith.constant 0 : index
      %c0_18 = arith.constant 0 : index
      %16 = vector.load %arg12[%c0_17, %c0_18] : memref<2x128xf32, #tpu.memory_space<vmem>>, vector<2x128xf32>
      %c0_19 = arith.constant 0 : index
      %c0_20 = arith.constant 0 : index
      %17 = vector.load %arg13[%c0_19, %c0_20] : memref<2x128xf32, #tpu.memory_space<vmem>>, vector<2x128xf32>
      %c0_21 = arith.constant 0 : index
      %c0_22 = arith.constant 0 : index
      %18 = vector.load %arg4[%c0_21, %c0_22] : memref<128x32xf32, #tpu.memory_space<vmem>>, vector<128x32xf32>
      %cst_23 = arith.constant dense<0.000000e+00> : vector<2x32xf32>
      %19 = tpu.matmul %16, %18, %cst_23 {dimension_numbers = #tpu.dot_dimension_numbers<[1], [0], [0], [1], [0, 0, 1, 1], [], []>} : vector<2x128xf32>, vector<128x32xf32>, vector<2x32xf32> -> vector<2x32xf32>
      %c0_24 = arith.constant 0 : index
      %c0_25 = arith.constant 0 : index
      %20 = vector.load %arg5[%c0_24, %c0_25] : memref<128x32xf32, #tpu.memory_space<vmem>>, vector<128x32xf32>
      %cst_26 = arith.constant dense<0.000000e+00> : vector<2x32xf32>
      %21 = tpu.matmul %17, %20, %cst_26 {dimension_numbers = #tpu.dot_dimension_numbers<[1], [0], [0], [1], [0, 0, 1, 1], [], []>} : vector<2x128xf32>, vector<128x32xf32>, vector<2x32xf32> -> vector<2x32xf32>
      %22 = arith.addf %19, %21 : vector<2x32xf32>
      %c0_27 = arith.constant 0 : index
      %c0_28 = arith.constant 0 : index
      %23 = vector.load %arg6[%c0_27, %c0_28] : memref<1x32xf32, #tpu.memory_space<vmem>>, vector<1x32xf32>
      %24 = vector.broadcast %23 : vector<1x32xf32> to vector<2x32xf32>
      %25 = arith.addf %22, %24 : vector<2x32xf32>
      %cst_29 = arith.constant 0.000000e+00 : f32
      %26 = vector.broadcast %cst_29 : f32 to vector<2x32xf32>
      %27 = arith.maximumf %25, %26 : vector<2x32xf32>
      %c0_30 = arith.constant 0 : index
      %c0_31 = arith.constant 0 : index
      %28 = vector.load %arg7[%c0_30, %c0_31] : memref<32x32xf32, #tpu.memory_space<vmem>>, vector<32x32xf32>
      %cst_32 = arith.constant dense<0.000000e+00> : vector<2x32xf32>
      %29 = tpu.matmul %27, %28, %cst_32 {dimension_numbers = #tpu.dot_dimension_numbers<[1], [0], [0], [1], [0, 0, 1, 1], [], []>} : vector<2x32xf32>, vector<32x32xf32>, vector<2x32xf32> -> vector<2x32xf32>
      %c0_33 = arith.constant 0 : index
      %c0_34 = arith.constant 0 : index
      %30 = vector.load %arg8[%c0_33, %c0_34] : memref<1x32xf32, #tpu.memory_space<vmem>>, vector<1x32xf32>
      %31 = vector.broadcast %30 : vector<1x32xf32> to vector<2x32xf32>
      %32 = arith.addf %29, %31 : vector<2x32xf32>
      %cst_35 = arith.constant 0.000000e+00 : f32
      %33 = vector.broadcast %cst_35 : f32 to vector<2x32xf32>
      %34 = arith.maximumf %32, %33 : vector<2x32xf32>
      %c0_36 = arith.constant 0 : index
      %c0_37 = arith.constant 0 : index
      %35 = vector.load %arg9[%c0_36, %c0_37] : memref<32x128xf32, #tpu.memory_space<vmem>>, vector<32x128xf32>
      %cst_38 = arith.constant dense<0.000000e+00> : vector<2x128xf32>
      %36 = tpu.matmul %34, %35, %cst_38 {dimension_numbers = #tpu.dot_dimension_numbers<[1], [0], [0], [1], [0, 0, 1, 1], [], []>} : vector<2x32xf32>, vector<32x128xf32>, vector<2x128xf32> -> vector<2x128xf32>
      %c0_39 = arith.constant 0 : index
      %c0_40 = arith.constant 0 : index
      %37 = vector.load %arg10[%c0_39, %c0_40] : memref<1x128xf32, #tpu.memory_space<vmem>>, vector<1x128xf32>
      %38 = vector.broadcast %37 : vector<1x128xf32> to vector<2x128xf32>
      %39 = arith.addf %36, %38 : vector<2x128xf32>
      %c0_41 = arith.constant 0 : index
      %c0_42 = arith.constant 0 : index
      %40 = vector.load %arg11[%c0_41, %c0_42] : memref<2x128xf32, #tpu.memory_space<vmem>>, vector<2x128xf32>
      tpu.vector_store %arg11[%c0_41, %c0_42], %39 {strides = array<i32>} : memref<2x128xf32, #tpu.memory_space<vmem>>, vector<2x128xf32>,
    } else {
    }
    return
  }
  func.func @transform_0(%arg0: i32, %arg1: i32) -> (i32, i32, i32) {
    %c0_i32 = arith.constant 0 : i32
    %c0_i32_0 = arith.constant 0 : i32
    return %arg0, %arg1, %c0_i32 : i32, i32, i32
  }
  func.func @transform_1(%arg0: i32, %arg1: i32) -> (i32, i32, i32) {
    %c0_i32 = arith.constant 0 : i32
    %c0_i32_0 = arith.constant 0 : i32
    return %arg0, %arg1, %c0_i32 : i32, i32, i32
  }
  func.func @transform_2(%arg0: i32, %arg1: i32) -> (i32, i32) {
    %c0_i32 = arith.constant 0 : i32
    %c0_i32_0 = arith.constant 0 : i32
    %c0_i32_1 = arith.constant 0 : i32
    return %c0_i32, %c0_i32_0 : i32, i32
  }
  func.func @transform_3(%arg0: i32, %arg1: i32) -> (i32, i32) {
    %c0_i32 = arith.constant 0 : i32
    %c0_i32_0 = arith.constant 0 : i32
    %c0_i32_1 = arith.constant 0 : i32
    return %c0_i32, %c0_i32_0 : i32, i32
  }
  func.func @transform_4(%arg0: i32, %arg1: i32) -> (i32, i32) {
    %c0_i32 = arith.constant 0 : i32
    %c0_i32_0 = arith.constant 0 : i32
    %c0_i32_1 = arith.constant 0 : i32
    return %c0_i32, %c0_i32_0 : i32, i32
  }
  func.func @transform_5(%arg0: i32, %arg1: i32) -> (i32, i32) {
    %c0_i32 = arith.constant 0 : i32
    %c0_i32_0 = arith.constant 0 : i32
    %c0_i32_1 = arith.constant 0 : i32
    return %c0_i32, %c0_i32_0 : i32, i32
  }
  func.func @transform_6(%arg0: i32, %arg1: i32) -> (i32, i32) {
    %c0_i32 = arith.constant 0 : i32
    %c0_i32_0 = arith.constant 0 : i32
    %c0_i32_1 = arith.constant 0 : i32
    return %c0_i32, %c0_i32_0 : i32, i32
  }
  func.func @transform_7(%arg0: i32, %arg1: i32) -> (i32, i32) {
    %c0_i32 = arith.constant 0 : i32
    %c0_i32_0 = arith.constant 0 : i32
    %c0_i32_1 = arith.constant 0 : i32
    return %c0_i32, %c0_i32_0 : i32, i32
  }
  func.func @transform_8(%arg0: i32, %arg1: i32) -> (i32, i32) {
    %c0_i32 = arith.constant 0 : i32
    %c0_i32_0 = arith.constant 0 : i32
    %c0_i32_1 = arith.constant 0 : i32
    return %c0_i32, %c0_i32_0 : i32, i32
  }
  func.func @transform_9(%arg0: i32, %arg1: i32) -> (i32, i32) {
    %c0_i32 = arith.constant 0 : i32
    %c0_i32_0 = arith.constant 0 : i32
    return %arg0, %c0_i32 : i32, i32
  }
}

</mosaic_0001>

<bundles_post_ra>
// kernel: tpu_custom_call.1
= control target key start
LH: loop header
LB: loop body
LE: loop exit
PB: predicated region body
PF: predicated region fallthrough
CT: control target
= control target key end

     0   :  { %v687_v3 = vmov 0.0|0.0   ;;  %v688_v8 = vmov 0.0   ;;  %vm689_vm0 = vmmov 0   ;;  %vm42_vm1 = vcmask 1041408   ;;  %s930_s0 = inlined_call_operand.vmem [shape: f32[2,2,128], index: 0, kind: input, shape index: {}]   ;;  %s931_s1 = inlined_call_operand.vmem [shape: f32[2,2,128], index: 1, kind: input, shape index: {}]   ;;  %s932_s2 = inlined_call_operand.vmem [shape: f32[128,32], index: 2, kind: input, shape index: {}]   ;;  %s933_s3 = inlined_call_operand.vmem [shape: f32[128,32], index: 3, kind: input, shape index: {}]   ;;  %s934_s4 = inlined_call_operand.vmem [shape: f32[1,32], index: 4, kind: input, shape index: {}]   ;;  %s935_s5 = inlined_call_operand.vmem [shape: f32[32,32], index: 5, kind: input, shape index: {}]   ;;  %s936_s6 = inlined_call_operand.vmem [shape: f32[1,32], index: 6, kind: input, shape index: {}]   ;;  %s937_s7 = inlined_call_operand.vmem [shape: f32[32,128], index: 7, kind: input, shape index: {}]   ;;  %s938_s8 = inlined_call_operand.vmem [shape: f32[1,128], index: 8, kind: input, shape index: {}]   ;;  %s939_s9 = inlined_call_operand.hbm [shape: f32[2,128], index: 9, kind: output, shape index: {}]  }
   0x1   :  { %v108_v0 = vld [vmem:[%s933_s3] sm:$0xff]  ;;  %v109_v1 = vld [vmem:[%s933_s3 + $0x8] sm:$0xff]  ;;  %599 = vmatprep.subr.bf16.mxu0 %v687_v3  ;;  %623 = vmatprep.subr.bf16.mxu1 %v687_v3  ;;  %v110_v6 = vld [vmem:[%s933_s3 + $0x10] sm:$0xff]  ;;  %37 = vst [vmem:[#allocation2] sm:$0x3] %v688_v8 }
   0x2   :  { %v92_v2 = vld [vmem:[%s932_s2] sm:$0xff]  ;;  %v600_v4 = vpack.c.bf16 %v109_v1, %v108_v0  ;;  %v93_v5 = vld [vmem:[%s932_s2 + $0x8] sm:$0xff]  ;;  %v111_v7 = vld [vmem:[%s933_s3 + $0x18] sm:$0xff]  ;;  %38 = vst [vmem:[#allocation3] sm:$0x3] %v688_v8  ;;  %539 = vmatprep.mubr.msk.f32.mxu0 %vm689_vm0, %v688_v8  ;;  %574 = vmatprep.mubr.msk.f32.mxu1 %vm689_vm0, %v688_v8 }
   0x3   :  { %v624_v9 = vpack.c.bf16 %v93_v5, %v92_v2  ;;  %v94_v10 = vld [vmem:[%s932_s2 + $0x10] sm:$0xff]  ;;  %v95_v11 = vld [vmem:[%s932_s2 + $0x18] sm:$0xff]  ;;  %v603_v12 = vpack.c.bf16 %v111_v7, %v110_v6  ;;  %v112_v14 = vld [vmem:[%s933_s3 + $0x20] sm:$0xff] }
   0x4   :  { %601 = vmatpush3.bf16.msra.mxu0 %v600_v4  ;;  %v627_v13 = vpack.c.bf16 %v95_v11, %v94_v10  ;;  %v113_v15 = vld [vmem:[%s933_s3 + $0x28] sm:$0xff]  ;;  %v96_v16 = vld [vmem:[%s932_s2 + $0x20] sm:$0xff]  ;;  %v114_v20 = vld [vmem:[%s933_s3 + $0x30] sm:$0xff] }
   0x5   :  { %625 = vmatpush3.bf16.msra.mxu1 %v624_v9  ;;  %602 = vmatprep.subr.bf16.mxu0 %v687_v3  ;;  %v97_v17 = vld [vmem:[%s932_s2 + $0x28] sm:$0xff]  ;;  %v606_v18 = vpack.c.bf16 %v113_v15, %v112_v14  ;;  %v115_v21 = vld [vmem:[%s933_s3 + $0x38] sm:$0xff]  ;;  %v98_v22 = vld [vmem:[%s932_s2 + $0x30] sm:$0xff] }
   0x6   :  { %626 = vmatprep.subr.bf16.mxu1 %v687_v3  ;;  %v630_v19 = vpack.c.bf16 %v97_v17, %v96_v16  ;;  %v99_v23 = vld [vmem:[%s932_s2 + $0x38] sm:$0xff]  ;;  %v116_v24 = vld [vmem:[%s933_s3 + $0x40] sm:$0xff]  ;;  %v117_v25 = vld [vmem:[%s933_s3 + $0x48] sm:$0xff]  ;;  %v609_v26 = vpack.c.bf16 %v115_v21, %v114_v20 }
   0x7   :  { %v100_v27 = vld [vmem:[%s932_s2 + $0x40] sm:$0xff]  ;;  %v101_v28 = vld [vmem:[%s932_s2 + $0x48] sm:$0xff]  ;;  %v633_v31 = vpack.c.bf16 %v99_v23, %v98_v22 }
   0x8   :  { %604 = vmatpush3.bf16.msra.mxu0 %v603_v12  ;;  %v40_v29 = vld [vmem:[%s930_s0] sm:$0x3]  ;;  %v41_v30 = vld [vmem:[%s930_s0 + $0x2] sm:$0x3] }
   0x9   :  { %628 = vmatpush3.bf16.msra.mxu1 %v627_v13  ;;  %605 = vmatprep.subr.bf16.mxu0 %v687_v3  ;;  %v43_v32 = vsel %vm42_vm1, %v40_v29, 0.0  ;;  %v50_v33 = vsel %vm42_vm1, %v41_v30, 0.0  ;;  %v65_v34 = vld [vmem:[%s931_s1] sm:$0x3]  ;;  %v66_v35 = vld [vmem:[%s931_s1 + $0x2] sm:$0x3] }
   0xa   :  { %629 = vmatprep.subr.bf16.mxu1 %v687_v3  ;;  %v44_v36 = vrot.slane %v43_v32, 4  ;;  %v51_v37 = vrot.slane %v50_v33, 4  ;;  %v67_v38 = vsel %vm42_vm1, %v65_v34, 0.0  ;;  %v74_v39 = vsel %vm42_vm1, %v66_v35, 0.0 }
   0xc   :  { %607 = vmatpush3.bf16.msra.mxu0 %v606_v18 }
   0xd   :  { %631 = vmatpush3.bf16.msra.mxu1 %v630_v19  ;;  %608 = vmatprep.subr.bf16.mxu0 %v687_v3 }
   0xe   :  { %632 = vmatprep.subr.bf16.mxu1 %v687_v3 }
   0xf   :  { %14 = vsyncpa [#allocation5], 0  ;;  %v68_v40 = vrot.slane %v67_v38, 4  ;;  %v75_v41 = vrot.slane %v74_v39, 4  ;;  %v612_v42 = vpack.c.bf16 %v117_v25, %v116_v24  ;;  %v45_v43 = vadd.f32 %v44_v36, %v43_v32  ;;  %v118_v46 = vld [vmem:[%s933_s3 + $0x50] sm:$0xff]  ;;  %v119_v47 = vld [vmem:[%s933_s3 + $0x58] sm:$0xff] }
  0x10   :  { %610 = vmatpush3.bf16.msra.mxu0 %v609_v26  ;;  %v52_v44 = vadd.f32 %v51_v37, %v50_v33  ;;  %v636_v45 = vpack.c.bf16 %v101_v28, %v100_v27  ;;  %v102_v50 = vld [vmem:[%s932_s2 + $0x50] sm:$0xff]  ;;  %v103_v51 = vld [vmem:[%s932_s2 + $0x58] sm:$0xff]  ;;  %v615_v56 = vpack.c.bf16 %v119_v47, %v118_v46  ;;  %v120_v60 = vld [vmem:[%s933_s3 + $0x60] sm:$0xff]  ;;  %vm59_vm2 = vcmask 1041409   ;;  %s690_s11 = smov [#allocation4]  }
  0x11   :  { %634 = vmatpush3.bf16.msra.mxu1 %v633_v31  ;;  %611 = vmatprep.subr.bf16.mxu0 %v687_v3  ;;  %v69_v48 = vadd.f32 %v68_v40, %v67_v38  ;;  %v76_v49 = vadd.f32 %v75_v41, %v74_v39  ;;  %v46_v52 = vrot.slane %v45_v43, 2  ;;  %v639_v59 = vpack.c.bf16 %v103_v51, %v102_v50  ;;  %v121_v61 = vld [vmem:[%s933_s3 + $0x68] sm:$0xff]  ;;  %v104_v0 = vld [vmem:[%s932_s2 + $0x60] sm:$0xff]  ;;  %v122_v13 = vld [vmem:[%s933_s3 + $0x70] sm:$0xff]  ;;  %s450_s12 = sshll.u32 %s690_s11, 4  ;;  %s451_s12 = int_to_ptr.vmem [resolvable:$true] %s450_s12 }
  0x12   :  { %635 = vmatprep.subr.bf16.mxu1 %v687_v3  ;;  %v53_v53 = vrot.slane %v52_v44, 2  ;;  %v105_v1 = vld [vmem:[%s932_s2 + $0x68] sm:$0xff]  ;;  %v618_v7 = vpack.c.bf16 %v121_v61, %v120_v60  ;;  %v39_v9 = vld [vmem:[#allocation2] sm:$0x3]  ;;  %v123_v14 = vld [vmem:[%s933_s3 + $0x78] sm:$0xff]  ;;  %vm284_vm3 = vcmask 261120   ;;  %p668_p1 = scmp.lt.s32.totalorder %s451_s12, %s451_s12 }
  0x13   :  { %v70_v54 = vrot.slane %v69_v48, 2  ;;  %v77_v55 = vrot.slane %v76_v49, 2  ;;  %v47_v57 = vadd.f32 %v46_v52, %v45_v43  ;;  %v642_v12 = vpack.c.bf16 %v105_v1, %v104_v0  ;;  %v64_v15 = vld [vmem:[#allocation3] sm:$0x3]  ;;  %v106_v18 = vld [vmem:[%s932_s2 + $0x70] sm:$0xff]  ;;  %v107_v19 = vld [vmem:[%s932_s2 + $0x78] sm:$0xff] }
  0x14   :  { %613 = vmatpush3.bf16.msra.mxu0 %v612_v42  ;;  %v54_v58 = vadd.f32 %v53_v53, %v52_v44  ;;  %v621_v23 = vpack.c.bf16 %v123_v14, %v122_v13  ;;  %v645_v25 = vpack.c.bf16 %v107_v19, %v106_v18  ;;  %v273_v28 = vld [vmem:[%s935_s5] sm:$0xff]  ;;  %v274_v29 = vld [vmem:[%s935_s5 + $0x8] sm:$0xff]  ;;  %v275_v31 = vld [vmem:[%s935_s5 + $0x10] sm:$0xff] }
  0x15   :  { %637 = vmatpush3.bf16.msra.mxu1 %v636_v45  ;;  %614 = vmatprep.subr.bf16.mxu0 %v687_v3  ;;  %v71_v62 = vadd.f32 %v70_v54, %v69_v48  ;;  %v78_v63 = vadd.f32 %v77_v55, %v76_v49  ;;  %v48_v2 = vrot.slane %v47_v57, 1  ;;  %v648_v30 = vpack.c.bf16 %v274_v29, %v273_v28  ;;  %v359_v33 = vld [vmem:[%s937_s7] sm:$0xff]  ;;  %v360_v34 = vld [vmem:[%s937_s7 + $0x8] sm:$0xff]  ;;  %v361_v44 = vld [vmem:[%s937_s7 + $0x10] sm:$0xff] }
  0x16   :  { %638 = vmatprep.subr.bf16.mxu1 %v687_v3  ;;  %v55_v4 = vrot.slane %v54_v58, 1  ;;  %v654_v35 = vpack.c.bf16 %v360_v34, %v359_v33  ;;  %v458_v38 = vld [vmem:[%s934_s4] ss:$0 sm:$0xff] }
  0x17   :  { %v72_v5 = vrot.slane %v71_v62, 1  ;;  %v79_v6 = vrot.slane %v78_v63, 1  ;;  %v49_v10 = vadd.f32 %v48_v2, %v47_v57  ;;  %v459_v46 = vld [vmem:[%s936_s6] ss:$0 sm:$0xff] }
  0x18   :  { %616 = vmatpush3.bf16.msra.mxu0 %v615_v56  ;;  %v56_v11 = vadd.f32 %v55_v4, %v54_v58  ;;  %v461_v51 = vld [vmem:[%s938_s8] ss:$0 sm:$0xff] }
  0x19   :  { %640 = vmatpush3.bf16.msra.mxu1 %v639_v59  ;;  %617 = vmatprep.subr.bf16.mxu0 %v687_v3  ;;  %v73_v16 = vadd.f32 %v72_v5, %v71_v62  ;;  %v80_v17 = vadd.f32 %v79_v6, %v78_v63 }
  0x1a   :  { %641 = vmatprep.subr.bf16.mxu1 %v687_v3  ;;  %v60_v20 = vsel %vm59_vm2, %v56_v11, %v49_v10 }
  0x1b   :  { %v62_v21 = vadd.f32 %v60_v20, %v39_v9  ;;  %v83_v22 = vsel %vm59_vm2, %v80_v17, %v73_v16 }
  0x1c   :  { %619 = vmatpush3.bf16.msra.mxu0 %v618_v7  ;;  %v85_v24 = vadd.f32 %v83_v22, %v64_v15 }
  0x1d   :  { %643 = vmatpush3.bf16.msra.mxu1 %v642_v12  ;;  %620 = vmatprep.subr.bf16.mxu0 %v687_v3  ;;  %63 = vst [vmem:[#allocation2] sm:$0x3] %v62_v21 }
  0x1e   :  { %644 = vmatprep.subr.bf16.mxu1 %v687_v3  ;;  %86 = vst [vmem:[#allocation3] sm:$0x3] %v85_v24 }
  0x20   :  { %622 = vmatpush3.bf16.msra.mxu0 %v621_v23 }
  0x21   :  { %646 = vmatpush3.bf16.msra.mxu1 %v645_v25  ;;  %647 = vmatprep.subr.bf16.mxu0 %v687_v3 }
  0x22   :  { %653 = vmatprep.subr.bf16.mxu1 %v687_v3 }
  0x24   :  { %v90_v26 = vld [vmem:[#allocation2] sm:$0x3] }
  0x25   :  { %v91_v27 = vld [vmem:[#allocation3] sm:$0x3]  ;;  %575 = vmatmul.mubr.f32.vlgmr.msra.gmra.mrb[0].mxu1 %v90_v26 }
  0x26   :  { %540 = vmatmul.mubr.f32.vlgmr.msra.gmra.mrb[0].mxu0 %v91_v27  ;;  %596 = vmatprep.mubr.msk.f32.mxu1 %vm689_vm0, %v688_v8 }
  0x27   :  { %585 = vmatprep.mubr.msk.f32.mxu0 %vm689_vm0, %v688_v8  ;;  %649 = vmatpush3.bf16.msra.mxu0 %v648_v30  ;;  %v276_v8 = vld [vmem:[%s935_s5 + $0x18] sm:$0xff] }
  0x28   :  { %650 = vmatprep.subr.bf16.mxu0 %v687_v3  ;;  %v651_v32 = vpack.c.bf16 %v276_v8, %v275_v31  ;;  %655 = vmatpush3.bf16.msra.mxu1 %v654_v35 }
  0x29   :  { %656 = vmatprep.subr.bf16.mxu1 %v687_v3  ;;  %v362_v3 = vld [vmem:[%s937_s7 + $0x18] sm:$0xff]  ;;  %s663_s7 = scalar_lea.vmem %s451_s12, 32 }
  0x2a   :  { %v657_v45 = vpack.c.bf16 %v362_v3, %v361_v44  ;;  %p664_p0 = scmp.ne.s32.totalorder %s451_s12, %s663_s7  ;;  %p669_p2 = scmp.lt.s32.totalorder %s663_s7, %s663_s7 }
  0x2b   :  { %652 = vmatpush3.bf16.msra.mxu0 %v651_v32 }
  0x2c   :  { %658 = vmatpush3.bf16.msra.mxu1 %v657_v45  ;;  %p670_p3 = por %p669_p2, %p668_p1 }
  0x2e   :  { %p671_p4 = pnand %p670_p3, %p664_p0 }
  0xf8   :  { %v260_v36 = vpop.f32.mrb[0].mxu1 }
  0xf9   :  { %v190_v37 = vpop.f32.mrb[0].mxu0  ;;  %v576_v39 = vpop.f32.mrb[1].mxu1 }
  0xfa   :  { %v261_v40 = vadd.f32 %v260_v36, %v190_v37  ;;  %v541_v41 = vpop.f32.mrb[1].mxu0 }
  0xfc   :  { %v271_v42 = vadd.f32 %v458_v38, %v261_v40 }
  0xfe   :  { %v272_v43 = vmax.f32 %v271_v42, 0.0 }
 0x100   :  { %586 = vmatmul.mubr.msk.f32.vlgmr.msra.gmra.mrb[2].mxu0 %vm284_vm3, %v272_v43 }
 0x1d3   :  { %v354_v47 = vpop.f32.mrb[2].mxu0 }
 0x1d4   :  { %v355_v48 = vadd.f32 %v459_v46, %v354_v47  ;;  %v587_v49 = vpop.f32.mrb[3].mxu0 }
 0x1d6   :  { %v358_v50 = vmax.f32 %v355_v48, 0.0 }
 0x1d8   :  { %597 = vmatmul.mubr.msk.f32.vlgmr.msra.gmra.mrb[2].mxu1 %vm284_vm3, %v358_v50 }
 0x2ab   :  { %v439_v52 = vpop.f32.mrb[2].mxu1 }
 0x2ac   :  { %v440_v53 = vadd.f32 %v461_v51, %v439_v52  ;;  %v598_v54 = vpop.f32.mrb[3].mxu1 }
 0x2ae   :  { %443 = vst [vmem:[#allocation4] sm:$0x3] %v440_v53 }
 0x2af   :  { %674 = shalt.err (!%p671_p4)
}
 0x2b0   :  { %s675_s14 = scalar_lea.hbm %s939_s9, 32 }
 0x2b1   :  { %p676_p5 = scmp.ne.s32.totalorder %s939_s9, %s675_s14  ;;  %p679_p6 = scmp.lt.u32.totalorder %s675_s14, %s939_s9 }
 0x2b3   :  { %p681_p7 = pnand %p679_p6, %p676_p5 }
 0x2b5   :  { %684 = shalt.err (!%p681_p7)
}
 0x2b6   :  { %453 = dma.vmem_to_hbm [thread:$0]  %s451_s12, 32, %s939_s9, [#allocation5]  }
 0x2b7   :  { %685 = dma.done.wait [#allocation5], 32  }
 0x2b8   :  { %686 = vsyncadd [#allocation5], 4294967264 }
 0x2b9   :  { %457 = vsyncpa [#allocation5], 1 }

</bundles_post_ra>
